<compile_context>
chip_gen: v7x
topology: tpu7x:2x2x1
jax: 0.10.0
libtpu: 0.0.40
codegen_flags: <defaults>
</compile_context>

<pallas_src>
import math

import jax
import jax.numpy as jnp
from jax import lax
from jax.experimental import pallas as pl
from jax.experimental.pallas import tpu as pltpu


def _round_up(x, n):
    return ((x + n - 1) // n) * n


# ---------------------------------------------------------------------------
# Pass 1: row-wise L2 normalization of the class weights (+ optional downcast).
# ---------------------------------------------------------------------------
def _normalize_rows_kernel(w_ref, o_ref):
    w = w_ref[...].astype(jnp.float32)                       # (TC, E)
    ss = jnp.sum(w * w, axis=-1, keepdims=True)
    # F.normalize eps=1e-12  ->  rsqrt(max(ss, eps^2)) == 1 / max(||w||, eps)
    o_ref[...] = (w * lax.rsqrt(jnp.maximum(ss, 1e-24))).astype(o_ref.dtype)


# ---------------------------------------------------------------------------
# Pass 2: main ArcFace kernel (one (TB, TC) output tile per grid step).
# ---------------------------------------------------------------------------
def make_arcface_kernel(s, m):
    cos_m = math.cos(m)
    sin_m = math.sin(m)
    th = math.cos(math.pi - m)
    mm = math.sin(math.pi - m) * m

    def kernel(x_ref, wn_ref, label_ref, out_ref):
        # x: (TB, E) raw embeddings, wn: (TC, E) pre-normalized weights (bf16/f32)
        x = x_ref[...].astype(jnp.float32)
        inv = lax.rsqrt(jnp.maximum(jnp.sum(x * x, axis=-1, keepdims=True), 1e-24))
        x_n = (x * inv).astype(wn_ref.dtype)                  # cast for the MXU

        # cosine = x_n @ wn.T without the transpose: contract both on the lane axis.
        cosine = lax.dot_general(
            x_n, wn_ref[...],
            dimension_numbers=(((1,), (1,)), ((), ())),
            preferred_element_type=jnp.float32)               # (TB, TC) f32

        tb, tc = cosine.shape
        label = label_ref[...]                                # (TB, 1) int32

        # Global column index of each lane in this C tile.
        col = lax.broadcasted_iota(jnp.int32, (tb, tc), 1) + pl.program_id(1) * tc
        mask = col == label                                   # (TB, TC)

        # phi math only for the one label column per row (O(TB), not O(TB*TC)).
        cos_y = jnp.sum(jnp.where(mask, cosine, 0.0), axis=-1, keepdims=True)
        sin_y = jnp.sqrt(jnp.clip(1.0 - cos_y * cos_y, 0.0, 1.0))
        phi = cos_y * cos_m - sin_y * sin_m
        phi = jnp.where(cos_y > th, phi, cos_y - mm)          # (TB, 1)

        out_ref[...] = (jnp.where(mask, phi, cosine) * s).astype(out_ref.dtype)

    return kernel


# ---------------------------------------------------------------------------
# Wrapper: padding, tiling, the two pallas_calls.
# ---------------------------------------------------------------------------
def arcface_forward(x, weight, label, *, s=30.0, m=1.5,
                    compute_dtype=jnp.bfloat16, tb=None, tc=None):
    B, E = x.shape
    C, E2 = weight.shape
    assert E == E2

    # Hardware-friendly padding / tiles. Production: use TB >= 128, TC up to
    # ~2048 (v7x, 64 MiB VMEM) or 4096-8192 (v5e/v6e, 128 MiB VMEM).
    E_pad = _round_up(E, 128)
    TB = _round_up(tb if tb is not None else min(_round_up(B, 8), 256), 8)
    B_pad = _round_up(B, TB)
    TC = _round_up(tc if tc is not None else min(_round_up(C, 128), 2048), 128)
    C_pad = _round_up(C, TC)

    x_p = jnp.zeros((B_pad, E_pad), jnp.float32).at[:B, :E].set(x.astype(jnp.float32))
    w_p = jnp.zeros((C_pad, E_pad), jnp.float32).at[:C, :E].set(weight.astype(jnp.float32))
    label_p = jnp.zeros((B_pad, 1), jnp.int32).at[:B, 0].set(label.astype(jnp.int32))

    # --- Pass 1: normalize W once (hoisted out of the per-batch-tile hot path).
    w_n = pl.pallas_call(
        _normalize_rows_kernel,
        out_shape=jax.ShapeDtypeStruct((C_pad, E_pad), compute_dtype),
        grid=(C_pad // TC,),
        in_specs=[pl.BlockSpec((TC, E_pad), lambda j: (j, 0))],
        out_specs=pl.BlockSpec((TC, E_pad), lambda j: (j, 0)),
        compiler_params=pltpu.CompilerParams(dimension_semantics=("parallel",)),
    )(w_p)

    # VMEM budget: double-buffered x / W / label / out tiles, with margin.
    w_bytes = jnp.dtype(compute_dtype).itemsize
    need = 2 * (TB * E_pad * 4 + TC * E_pad * w_bytes + TB * TC * 4 + TB * 4)
    vmem_limit = int(min(max(2 * need, 32 * 1024 * 1024), 64 * 1024 * 1024))

    # --- Pass 2: main ArcFace kernel over a (B/TB, C/TC) parallel grid.
    kernel = make_arcface_kernel(s, m)
    out = pl.pallas_call(
        kernel,
        out_shape=jax.ShapeDtypeStruct((B_pad, C_pad), jnp.float32),
        grid=(B_pad // TB, C_pad // TC),
        in_specs=[
            pl.BlockSpec((TB, E_pad), lambda i, j: (i, 0)),   # x tile
            pl.BlockSpec((TC, E_pad), lambda i, j: (j, 0)),   # normalized W tile
            pl.BlockSpec((TB, 1), lambda i, j: (i, 0)),       # labels
        ],
        out_specs=pl.BlockSpec((TB, TC), lambda i, j: (i, j)),
        compiler_params=pltpu.CompilerParams(
            dimension_semantics=("parallel", "parallel"),
            vmem_limit_bytes=vmem_limit),
    )(x_p, w_n, label_p)

    return out[:B, :C]


if __name__ == "__main__":
    # Small shapes that still exercise the grid: B grid = 2, C grid = 3,
    # with padding on E (32 -> 128) and C (300 -> 384).
    B, E, C = 16, 32, 300
    s_scale, margin = 30.0, 1.5

    key = jax.random.PRNGKey(0)
    kx, kw, kl = jax.random.split(key, 3)

    x = jax.random.normal(kx, (B, E), dtype=jnp.float32)
    bound = math.sqrt(6.0 / (E + C))                 # xavier_uniform_ on (C, E)
    weight = jax.random.uniform(kw, (C, E), dtype=jnp.float32,
                                minval=-bound, maxval=bound)
    label = jax.random.randint(kl, (B,), 0, C, dtype=jnp.int32)

    def ref_fn(mxu_dtype):
        x_n = x / jnp.maximum(jnp.linalg.norm(x, axis=-1, keepdims=True), 1e-12)
        w_n = weight / jnp.maximum(jnp.linalg.norm(weight, axis=-1, keepdims=True), 1e-12)
        cosine = (x_n.astype(mxu_dtype).astype(jnp.float32)
                  @ w_n.astype(mxu_dtype).astype(jnp.float32).T)
        sine = jnp.sqrt(jnp.clip(1.0 - cosine ** 2, 0.0, 1.0))
        phi = cosine * math.cos(margin) - sine * math.sin(margin)
        phi = jnp.where(cosine > math.cos(math.pi - margin), phi,
                        cosine - math.sin(math.pi - margin) * margin)
        rows = jnp.arange(B)
        return cosine.at[rows, label].set(phi[rows, label]) * s_scale

    # 1) Exact-semantics check: f32 MXU path, small tiles to exercise the grid
    #    and the per-tile iota offset.
    out_f32 = arcface_forward(x, weight, label, s=s_scale, m=margin,
                              compute_dtype=jnp.float32, tb=8, tc=128)
    jax.block_until_ready(out_f32)
    ref_f32 = ref_fn(jnp.float32)
    assert out_f32.shape == (B, C)
    assert jnp.allclose(out_f32, ref_f32, atol=1e-3, rtol=1e-4), \
        float(jnp.max(jnp.abs(out_f32 - ref_f32)))

    # 2) Production path: bf16 MXU inputs with f32 accumulation (looser tolerance,
    #    compared against a reference that applies the same bf16 cast).
    out_bf16 = arcface_forward(x, weight, label, s=s_scale, m=margin,
                               compute_dtype=jnp.bfloat16, tc=128)
    jax.block_until_ready(out_bf16)
    ref_bf16 = ref_fn(jnp.bfloat16)
    assert jnp.allclose(out_bf16, ref_bf16, atol=2e-2, rtol=2e-2), \
        float(jnp.max(jnp.abs(out_bf16 - ref_bf16)))

    print("KERNEL_OK")
</pallas_src>

<mosaic_0001>
module attributes {stable_mosaic.version = 11 : i64} {
  func.func @_normalize_rows_kernel(%arg0: i32, %arg1: memref<128x128xf32, #tpu.memory_space<vmem>>, %arg2: memref<128x128xf32, #tpu.memory_space<vmem>>) attributes {dimension_semantics = [#tpu.dimension_semantics<parallel>], iteration_bounds = array<i64: 3>, scalar_prefetch = 0 : i64, scratch_operands = 0 : i64, tpu.core_type = #tpu.core_type<tc>, window_params = [{transform_indices = @transform_0, window_bounds = array<i64: 128, 128>}, {transform_indices = @transform_1, window_bounds = array<i64: 128, 128>}]} {
    %c0 = arith.constant 0 : index
    %c0_0 = arith.constant 0 : index
    %0 = vector.load %arg1[%c0, %c0_0] : memref<128x128xf32, #tpu.memory_space<vmem>>, vector<128x128xf32>
    %1 = arith.mulf %0, %0 : vector<128x128xf32>
    %cst = arith.constant dense<0.000000e+00> : vector<128xf32>
    %2 = vector.multi_reduction <add>, %1, %cst [1] : vector<128x128xf32> to vector<128xf32>
    %3 = vector.shape_cast %2 : vector<128xf32> to vector<128x1xf32>
    %cst_1 = arith.constant 1.000000e-24 : f32
    %4 = vector.broadcast %cst_1 : f32 to vector<128x1xf32>
    %5 = arith.maximumf %3, %4 : vector<128x1xf32>
    %6 = math.rsqrt %5 : vector<128x1xf32>
    %7 = vector.broadcast %6 : vector<128x1xf32> to vector<128x128xf32>
    %8 = arith.mulf %0, %7 : vector<128x128xf32>
    %c0_2 = arith.constant 0 : index
    %c0_3 = arith.constant 0 : index
    %9 = vector.load %arg2[%c0_2, %c0_3] : memref<128x128xf32, #tpu.memory_space<vmem>>, vector<128x128xf32>
    tpu.vector_store %arg2[%c0_2, %c0_3], %8 {strides = array<i32>} : memref<128x128xf32, #tpu.memory_space<vmem>>, vector<128x128xf32>,
    return
  }
  func.func @transform_0(%arg0: i32) -> (i32, i32) {
    %c0_i32 = arith.constant 0 : i32
    %c0_i32_0 = arith.constant 0 : i32
    return %arg0, %c0_i32 : i32, i32
  }
  func.func @transform_1(%arg0: i32) -> (i32, i32) {
    %c0_i32 = arith.constant 0 : i32
    %c0_i32_0 = arith.constant 0 : i32
    return %arg0, %c0_i32 : i32, i32
  }
}

</mosaic_0001>

<bundles_post_ra>
// kernel: tpu_custom_call.1
= control target key start
LH: loop header
LB: loop body
LE: loop exit
PB: predicated region body
PF: predicated region fallthrough
CT: control target
= control target key end

     0   :  { %6 = vsyncpa [#allocation3], 0  ;;  %s845_s0 = inlined_call_operand.hbm [shape: f32[384,128], index: 0, kind: input, shape index: {}]   ;;  %s846_s1 = inlined_call_operand.hbm [shape: f32[384,128], index: 1, kind: output, shape index: {}]  }
   0x1   :  { %8 = vsyncpa [#allocation3 + $0x1], 0 }
   0x2   :  { %9 = vsyncpa [#allocation4], 0 }
   0x3   :  { %11 = vsyncpa [#allocation4 + $0x1], 0  ;;  %s564_s6 = smov 0   ;;  %s566_s7 = smov 0  }
   0x4   :  { %s568_s8 = smov 0   ;;  %s570_s9 = smov 0  }
   0x5 LB: > { %s585_s10 = sadd.s32 4294967295, %s546_s9   ;;  %s352_s11 = sadd.s32 4294967294, %s546_s9   ;;  %s546_s9 = sphi %s570_s9, %s858_s9   ;;  %s542_s8 = sphi %s568_s8, %s857_s8   ;;  %s538_s7 = sphi %s566_s7, %s856_s7   ;;  %s534_s6 = sphi %s564_s6, %s855_s6  }
   0x6   : > { %s589_s12 = sadd.s32 1, %s546_s9   ;;  %s24_s13 = sadd.s32 1, %s542_s8 }
   0x7   : > { %s21_s14 = ssub.s32 %s546_s9, %s589_s12  ;;  %p31_p0 = scmp.ne.s32.totalorder %s542_s8, %s538_s7 }
   0x8   : > { %p22_p1 = scmp.eq.s32.totalorder %s21_s14, 0  ;;  %p32_p2 = scmp.eq.s32.totalorder %s546_s9, 0 }
   0x9   : > { %p37_p3 = scmp.ne.s32.totalorder %s538_s7, %s534_s6  ;;  %p38_p4 = scmp.eq.s32.totalorder %s585_s10, 0 }
   0xa   : > { %s601_s15 = scalar_select %p22_p1, %s542_s8, %s24_s13  }
   0xb   : > { %p603_p5 = por %p32_p2, %p31_p0  ;;  %p607_p6 = por %p38_p4, %p37_p3 }
   0xc   : > { %p61_p7 = scmp.eq.s32.totalorder %s585_s10, 2  ;;  %p67_p8 = scmp.eq.s32.totalorder %s352_s11, 2 }
   0xd   : > { %p380_p9 = scmp.lt.s32.totalorder %s546_s9, 3  ;;  %s87_s20 = sand.u32 1, %s542_s8  }
   0xe   : > { %p613_p10 = por %p61_p7, %p31_p0  ;;  %p617_p11 = por %p67_p8, %p37_p3 }
   0xf   : > { %s366_s21 = sshll.u32 %s546_s9, 11  ;;  %s355_s22 = sshll.u32 %s87_s20, 7 }
  0x10   : > { %s850_s18 = scalar_select %p613_p10, 1, 0 }
  0x11   : > { %s851_s19 = scalar_select %p617_p11, 1, 0 }
  0x12   : > { %s626_s25 = scalar_lea.hbm %s845_s0, %s366_s21  ;;  %s91_s26 = scalar_lea.vmem [#allocation2], %s355_s22 }
  0x13   : > { %s98_s27 = sshll.u32 %s91_s26, 4  ;;  %p630_p12 = pnand %p380_p9, %p603_p5  ;;  %s634_s27 = int_to_ptr.vmem [resolvable:$true] %s98_s27 }
  0x14   : > { %s636_s29 = scalar_lea.sflag [#allocation3], %s87_s20  ;;  %s450_s30 = scalar_lea.hbm %s626_s25, 2048 }
  0x15   : > { %p451_p13 = scmp.ne.s32.totalorder %s626_s25, %s450_s30  ;;  %p452_p0 = pneg %p630_p12 }
  0x16   : > { %s455_s4 = scalar_lea.hbm %s845_s0, 6144  ;;  %p456_p3 = scmp.lt.u32.totalorder %s626_s25, %s845_s0 }
  0x17   : > { %p453_p1 = pnand %p452_p0, %p451_p13  ;;  %p457_p4 = scmp.lt.u32.totalorder %s455_s4, %s450_s30 }
  0x18   : > { %p459_p7 = scmp.lt.u32.totalorder %s450_s30, %s626_s25 }
  0x19   : > { %p454_p2 = pneg %p453_p1  ;;  %p458_p5 = por %p457_p4, %p456_p3 }
  0x1b   : > { %p460_p8 = por %p459_p7, %p458_p5 }
  0x1d   : > { %p461_p9 = pnand %p460_p8, %p454_p2 }
  0x1f   : > { %464 = shalt.err (!%p461_p9)
}
  0x20   : > { %s465_s13 = scalar_lea.vmem %s634_s27, 2048  ;;  %s548_s14 = smov [#allocation2]  }
  0x21   : > { %p466_p13 = scmp.ne.s32.totalorder %s634_s27, %s465_s13  ;;  %s470_s16 = sshll.u32 %s548_s14, 4  ;;  %s471_s16 = int_to_ptr.vmem [resolvable:$false] %s470_s16 }
  0x22   : > { %s472_s20 = scalar_lea.vmem %s471_s16, 4096  ;;  %p473_p10 = scmp.lt.s32.totalorder %s634_s27, %s471_s16 }
  0x23   : > { %p468_p1 = pnand %p466_p13, %p452_p0  ;;  %p474_p3 = scmp.lt.s32.totalorder %s472_s20, %s465_s13 }
  0x25   : > { %p469_p11 = pneg %p468_p1  ;;  %p475_p4 = por %p474_p3, %p473_p10 }
  0x27   : > { %p476_p5 = pnand %p475_p4, %p469_p11 }
  0x29   : > { %479 = shalt.err (!%p476_p5)
}
  0x2a   : > { %s549_s21 = smov 128   ;;  %s550_s22 = smov 8  }
  0x2b   : > { %375 = dma.hbm_to_vmem [thread:$0]  (!%p630_p12), %s626_s25, 2048, %s634_s27, %s636_s29, %s549_s21, %s549_s21, %s550_s22  }
  0x2c   : > { %p358_p0 = scmp.ge.s32.totalorder %s546_s9, 1  ;;  %p106_p2 = scmp.lt.s32.totalorder %s546_s9, 4 }
  0x2e   : > { %p107_p7 = pnand %p358_p0, %p106_p2 }
  0x2f   : > { %s667_s23 = sand.u32 (!%p107_p7), 1, %s538_s7  }
  0x30   : > { %110 = sbr.rel (%p107_p7) target bundleno = 260 (0x104), region = 24  ;;  %s359_s24 = sshll.u32 (!%p107_p7), %s667_s23, 7 }
  0x31   : > { %s113_s26 = scalar_lea.sflag (!%p107_p7), [#allocation3], %s667_s23  ;;  %s673_s30 = scalar_lea.vmem (!%p107_p7), [#allocation2], %s359_s24 }
  0x37   : > { %525 = dma.done.wait (%p607_p6), %s113_s26, 2048  }
  0x38   : > { %527 = vsyncadd (%p607_p6), %s113_s26, 4294965248  ;;  %v680_v0 = vld [vmem:[%s673_s30 + $0x10] sm:$0xff]  ;;  %v683_v1 = vld [vmem:[%s673_s30] sm:$0xff]  ;;  %s763_s17 = scalar_lea.vmem [#allocation5], %s359_s24  ;;  %s367_s25 = sshll.u32 %s585_s10, 11 }
  0x39   : > { %v686_v2 = vld [vmem:[%s673_s30 + $0x18] sm:$0xff]  ;;  %v155_v3 = vmul.f32 %v680_v0, %v680_v0  ;;  %v153_v4 = vmul.f32 %v683_v1, %v683_v1  ;;  %v693_v5 = vld [vmem:[%s673_s30 + $0x8] sm:$0xff]  ;;  %v703_v9 = vld [vmem:[%s673_s30 + $0x20] sm:$0xff]  ;;  %s279_s27 = sshll.u32 %s763_s17, 4  ;;  %s797_s2 = scalar_lea.hbm %s846_s1, %s367_s25  ;;  %s799_s27 = int_to_ptr.vmem [resolvable:$true] %s279_s27 }
  0x3a   : > { %v156_v6 = vmul.f32 %v686_v2, %v686_v2  ;;  %v154_v7 = vmul.f32 %v693_v5, %v693_v5  ;;  %v700_v8 = vld [vmem:[%s673_s30 + $0x28] sm:$0xff]  ;;  %v157_v11 = vmul.f32 %v703_v9, %v703_v9  ;;  %v710_v12 = vld [vmem:[%s673_s30 + $0x38] sm:$0xff]  ;;  %v713_v13 = vld [vmem:[%s673_s30 + $0x30] sm:$0xff]  ;;  %s266_s10 = scalar_lea.sflag [#allocation4], %s667_s23  ;;  %s480_s3 = scalar_lea.vmem %s799_s27, 2048 }
  0x3b   : > { %173 = vadd.xlane.f32.xlu1 %v155_v3  ;;  %169 = vadd.xlane.f32.xlu0 %v153_v4  ;;  %v158_v10 = vmul.f32 %v700_v8, %v700_v8  ;;  %v160_v14 = vmul.f32 %v710_v12, %v710_v12  ;;  %v159_v15 = vmul.f32 %v713_v13, %v713_v13  ;;  %v720_v16 = vld [vmem:[%s673_s30 + $0x48] sm:$0xff]  ;;  %v723_v17 = vld [vmem:[%s673_s30 + $0x40] sm:$0xff]  ;;  %v730_v20 = vld [vmem:[%s673_s30 + $0x58] sm:$0xff]  ;;  %p481_p6 = scmp.ne.s32.totalorder %s799_s27, %s480_s3  ;;  %p853_p10 = scmp.ne.s32.totalorder %s850_s18, 0 }
  0x3c   : > { %v162_v18 = vmul.f32 %v720_v16, %v720_v16  ;;  %v161_v19 = vmul.f32 %v723_v17, %v723_v17  ;;  %v733_v21 = vld [vmem:[%s673_s30 + $0x50] sm:$0xff]  ;;  %v164_v22 = vmul.f32 %v730_v20, %v730_v20  ;;  %v740_v24 = vld [vmem:[%s673_s30 + $0x68] sm:$0xff]  ;;  %v743_v25 = vld [vmem:[%s673_s30 + $0x60] sm:$0xff]  ;;  %s551_s4 = smov [#allocation5]  }
  0x3d   : > { %v163_v23 = vmul.f32 %v733_v21, %v733_v21  ;;  %v166_v26 = vmul.f32 %v740_v24, %v740_v24  ;;  %v165_v27 = vmul.f32 %v743_v25, %v743_v25  ;;  %v750_v28 = vld [vmem:[%s673_s30 + $0x78] sm:$0xff]  ;;  %v753_v29 = vld [vmem:[%s673_s30 + $0x70] sm:$0xff]  ;;  %p482_p11 = pnand %p481_p6, %p853_p10  ;;  %s484_s5 = sshll.u32 %s551_s4, 4  ;;  %s485_s5 = int_to_ptr.vmem [resolvable:$false] %s484_s5 }
  0x3e   : > { %v168_v30 = vmul.f32 %v750_v28, %v750_v28  ;;  %v167_v31 = vmul.f32 %v753_v29, %v753_v29  ;;  %s486_s11 = scalar_lea.vmem %s485_s5, 4096  ;;  %p487_p8 = scmp.lt.s32.totalorder %s799_s27, %s485_s5 }
  0x3f   : > { %175 = vadd.xlane.f32.xlu1 %v156_v6  ;;  %171 = vadd.xlane.f32.xlu0 %v154_v7  ;;  %p483_p12 = pneg %p482_p11  ;;  %p488_p9 = scmp.lt.s32.totalorder %s486_s11, %s480_s3 }
  0x41   : > { %p489_p13 = por %p488_p9, %p487_p8 }
  0x43   : > { %179 = vadd.xlane.f32.xlu1 %v158_v10  ;;  %177 = vadd.xlane.f32.xlu0 %v157_v11  ;;  %p490_p1 = pnand %p489_p13, %p483_p12 }
  0x47   : > { %183 = vadd.xlane.f32.xlu1 %v160_v14  ;;  %181 = vadd.xlane.f32.xlu0 %v159_v15 }
  0x4b   : > { %187 = vadd.xlane.f32.xlu1 %v162_v18  ;;  %185 = vadd.xlane.f32.xlu0 %v161_v19 }
  0x4f   : > { %191 = vadd.xlane.f32.xlu1 %v164_v22  ;;  %189 = vadd.xlane.f32.xlu0 %v163_v23 }
  0x53   : > { %195 = vadd.xlane.f32.xlu1 %v166_v26  ;;  %193 = vadd.xlane.f32.xlu0 %v165_v27 }
  0x57   : > { %199 = vadd.xlane.f32.xlu1 %v168_v30  ;;  %197 = vadd.xlane.f32.xlu0 %v167_v31 }
  0xc8   : > { %v174_v32 = vpop.xlane.xlu1 %173  ;;  %v170_v33 = vpop.xlane.xlu0 %169 }
  0xc9   : > { %v203_v34 = vmax.f32 %v174_v32, 1e-24  ;;  %v201_v35 = vmax.f32 %v170_v33, 1e-24 }
  0xcb   : > { %418 = vrsqrt.f32 %v203_v34 }
  0xcc   : > { %420 = vrsqrt.f32 %v201_v35  ;;  %v176_v36 = vpop.xlane.xlu1 %175  ;;  %v172_v37 = vpop.xlane.xlu0 %171 }
  0xcd   : > { %v204_v38 = vmax.f32 %v176_v36, 1e-24  ;;  %v202_v39 = vmax.f32 %v172_v37, 1e-24 }
  0xcf   : > { %422 = vrsqrt.f32 %v204_v38 }
  0xd0   : > { %424 = vrsqrt.f32 %v202_v39  ;;  %v180_v40 = vpop.xlane.xlu1 %179  ;;  %v178_v41 = vpop.xlane.xlu0 %177 }
  0xd1   : > { %v206_v42 = vmax.f32 %v180_v40, 1e-24  ;;  %v205_v43 = vmax.f32 %v178_v41, 1e-24 }
  0xd3   : > { %426 = vrsqrt.f32 %v206_v42 }
  0xd4   : > { %428 = vrsqrt.f32 %v205_v43  ;;  %v184_v44 = vpop.xlane.xlu1 %183  ;;  %v182_v45 = vpop.xlane.xlu0 %181 }
  0xd5   : > { %v419_v46 = vpop.eup %418  ;;  %v208_v47 = vmax.f32 %v184_v44, 1e-24  ;;  %v207_v48 = vmax.f32 %v182_v45, 1e-24 }
  0xd6   : > { %v421_v49 = vpop.eup %420  ;;  %v235_v50 = vmul.f32 %v419_v46, %v680_v0 }
  0xd7   : > { %v233_v51 = vmul.f32 %v421_v49, %v683_v1  ;;  %430 = vrsqrt.f32 %v208_v47 }
  0xd8   : > { %251 = vst [vmem:[%s763_s17 + $0x10] sm:$0xff] %v235_v50  ;;  %432 = vrsqrt.f32 %v207_v48  ;;  %v188_v52 = vpop.xlane.xlu1 %187  ;;  %v186_v53 = vpop.xlane.xlu0 %185 }
  0xd9   : > { %v423_v54 = vpop.eup %422  ;;  %249 = vst [vmem:[%s763_s17] sm:$0xff] %v233_v51  ;;  %v210_v55 = vmax.f32 %v188_v52, 1e-24  ;;  %v209_v56 = vmax.f32 %v186_v53, 1e-24 }
  0xda   : > { %v425_v57 = vpop.eup %424  ;;  %v236_v58 = vmul.f32 %v423_v54, %v686_v2 }
  0xdb   : > { %v234_v59 = vmul.f32 %v425_v57, %v693_v5  ;;  %434 = vrsqrt.f32 %v210_v55 }
  0xdc   : > { %252 = vst [vmem:[%s763_s17 + $0x18] sm:$0xff] %v236_v58  ;;  %436 = vrsqrt.f32 %v209_v56  ;;  %v192_v60 = vpop.xlane.xlu1 %191  ;;  %v190_v61 = vpop.xlane.xlu0 %189 }
  0xdd   : > { %v427_v62 = vpop.eup %426  ;;  %250 = vst [vmem:[%s763_s17 + $0x8] sm:$0xff] %v234_v59  ;;  %v212_v63 = vmax.f32 %v192_v60, 1e-24  ;;  %v211_v0 = vmax.f32 %v190_v61, 1e-24 }
  0xde   : > { %v429_v1 = vpop.eup %428  ;;  %v238_v3 = vmul.f32 %v427_v62, %v700_v8 }
  0xdf   : > { %v237_v4 = vmul.f32 %v429_v1, %v703_v9  ;;  %438 = vrsqrt.f32 %v212_v63 }
  0xe0   : > { %254 = vst [vmem:[%s763_s17 + $0x28] sm:$0xff] %v238_v3  ;;  %440 = vrsqrt.f32 %v211_v0  ;;  %v196_v2 = vpop.xlane.xlu1 %195  ;;  %v194_v5 = vpop.xlane.xlu0 %193 }
  0xe1   : > { %v431_v6 = vpop.eup %430  ;;  %253 = vst [vmem:[%s763_s17 + $0x20] sm:$0xff] %v237_v4  ;;  %v214_v7 = vmax.f32 %v196_v2, 1e-24  ;;  %v213_v10 = vmax.f32 %v194_v5, 1e-24 }
  0xe2   : > { %v433_v11 = vpop.eup %432  ;;  %v240_v14 = vmul.f32 %v431_v6, %v710_v12 }
  0xe3   : > { %v239_v15 = vmul.f32 %v433_v11, %v713_v13  ;;  %442 = vrsqrt.f32 %v214_v7 }
  0xe4   : > { %256 = vst [vmem:[%s763_s17 + $0x38] sm:$0xff] %v240_v14  ;;  %444 = vrsqrt.f32 %v213_v10  ;;  %v200_v8 = vpop.xlane.xlu1 %199  ;;  %v198_v9 = vpop.xlane.xlu0 %197 }
  0xe5   : > { %v435_v18 = vpop.eup %434  ;;  %255 = vst [vmem:[%s763_s17 + $0x30] sm:$0xff] %v239_v15  ;;  %v216_v19 = vmax.f32 %v200_v8, 1e-24  ;;  %v215_v22 = vmax.f32 %v198_v9, 1e-24 }
  0xe6   : > { %v437_v23 = vpop.eup %436  ;;  %v242_v26 = vmul.f32 %v435_v18, %v720_v16 }
  0xe7   : > { %v241_v12 = vmul.f32 %v437_v23, %v723_v17  ;;  %446 = vrsqrt.f32 %v216_v19 }
  0xe8   : > { %258 = vst [vmem:[%s763_s17 + $0x48] sm:$0xff] %v242_v26  ;;  %448 = vrsqrt.f32 %v215_v22 }
  0xe9   : > { %v439_v13 = vpop.eup %438  ;;  %257 = vst [vmem:[%s763_s17 + $0x40] sm:$0xff] %v241_v12 }
  0xea   : > { %v441_v27 = vpop.eup %440  ;;  %v244_v30 = vmul.f32 %v439_v13, %v730_v20 }
  0xeb   : > { %v243_v31 = vmul.f32 %v441_v27, %v733_v21 }
  0xec   : > { %260 = vst [vmem:[%s763_s17 + $0x58] sm:$0xff] %v244_v30 }
  0xed   : > { %v443_v32 = vpop.eup %442  ;;  %259 = vst [vmem:[%s763_s17 + $0x50] sm:$0xff] %v243_v31 }
  0xee   : > { %v445_v16 = vpop.eup %444  ;;  %v246_v17 = vmul.f32 %v443_v32, %v740_v24 }
  0xef   : > { %v245_v33 = vmul.f32 %v445_v16, %v743_v25 }
  0xf0   : > { %262 = vst [vmem:[%s763_s17 + $0x68] sm:$0xff] %v246_v17 }
  0xf1   : > { %v447_v34 = vpop.eup %446  ;;  %261 = vst [vmem:[%s763_s17 + $0x60] sm:$0xff] %v245_v33 }
  0xf2   : > { %v449_v20 = vpop.eup %448  ;;  %v248_v21 = vmul.f32 %v447_v34, %v750_v28 }
  0xf3   : > { %v247_v24 = vmul.f32 %v449_v20, %v753_v29 }
  0xf4   : > { %264 = vst [vmem:[%s763_s17 + $0x78] sm:$0xff] %v248_v21 }
  0xf5   : > { %263 = vst [vmem:[%s763_s17 + $0x70] sm:$0xff] %v247_v24 }
  0xf6   : > { %493 = shalt.err (!%p490_p1)
}
  0xf7   : > { %s494_s13 = scalar_lea.hbm %s797_s2, 2048  ;;  %s498_s20 = scalar_lea.hbm %s846_s1, 6144 }
  0xf8   : > { %p495_p3 = scmp.ne.s32.totalorder %s797_s2, %s494_s13  ;;  %p499_p0 = scmp.lt.u32.totalorder %s797_s2, %s846_s1 }
  0xf9   : > { %p500_p2 = scmp.lt.u32.totalorder %s498_s20, %s494_s13  ;;  %p502_p6 = scmp.lt.u32.totalorder %s494_s13, %s797_s2 }
  0xfa   : > { %p496_p4 = pnand %p495_p3, %p853_p10 }
  0xfb   : > { %p501_p7 = por %p500_p2, %p499_p0 }
  0xfc   : > { %p497_p5 = pneg %p496_p4 }
  0xfd   : > { %p503_p11 = por %p502_p6, %p501_p7 }
  0xff   : > { %p504_p12 = pnand %p503_p11, %p497_p5 }
 0x101   : > { %507 = shalt.err (!%p504_p12)
}
 0x102   : > { %s552_s24 = smov 128   ;;  %s553_s26 = smov 8  }
 0x103   : > { %370 = dma.vmem_to_hbm [thread:$0]  (%p853_p10), %s799_s27, 2048, %s797_s2, %s266_s10, %s552_s24, %s552_s24, %s553_s26  }
 0x104 PF: > { %p381_p8 = scmp.ge.s32.totalorder %s546_s9, 2  ;;  %s294_s30 = sand.u32 1, %s534_s6  }
 0x105   : > { %p854_p9 = scmp.ne.s32.totalorder %s851_s19, 0  ;;  %s295_s17 = scalar_lea.sflag [#allocation4], %s294_s30 }
 0x107   : > { %p377_p13 = pnand %p381_p8, %p854_p9 }
 0x109   : > { %529 = dma.done.wait (!%p377_p13), %s295_s17, 2048  }
 0x10a   : > { %531 = vsyncadd (!%p377_p13), %s295_s17, 4294965248  ;;  %p14_p1 = scmp.ge.s32.totalorder %s589_s12, 5   ;;  %s855_s6 = smov %s538_s7 }
 0x10b   : > { %s856_s7 = smov %s542_s8  ;;  %s857_s8 = smov %s601_s15 }
 0x10c   : > { %s858_s9 = smov %s589_s12  ;;  %16 = sbr.rel (!%p14_p1) target bundleno = 5 (0x5), region = 69 }
 0x113   :  { %300 = vsyncpa [#allocation3], 1 }
 0x114   :  { %302 = vsyncpa [#allocation3 + $0x1], 1 }
 0x115   :  { %303 = vsyncpa [#allocation4], 1 }
 0x116   :  { %305 = vsyncpa [#allocation4 + $0x1], 1 }

</bundles_post_ra>
